<compile_context>
chip_gen: v7x
topology: tpu7x:2x2x1
jax: 0.10.0
libtpu: 0.0.40
codegen_flags: <defaults>
</compile_context>

<pallas_src>
import jax
import jax.numpy as jnp
from jax.experimental import pallas as pl
from jax.experimental.pallas import tpu as pltpu


LANE = 128
N_SPLIT = 2                      # leading "parallel" axis for the reduce (2 TCs on v7x)
TILE_R_MAX = 4096                # edge-reduce rows per block (2 MiB f32 block)
SCORE_BLOCK_BYTES = 4 * 1024 * 1024
VMEM_LIMIT_BYTES = 32 * 1024 * 1024


def _round_up(x: int, m: int) -> int:
    return ((x + m - 1) // m) * m


# --------------------------------------------------------------------------
# Kernel 1: per-node scores  s = sigmoid(z @ [w1 | w2] + [b1 | b2])
# --------------------------------------------------------------------------
def _node_score_kernel(z_ref, w_ref, b_ref, s_ref):
    # Native-dtype operands straight into the MXU, f32 accumulation.
    logits = jnp.dot(z_ref[...], w_ref[...],
                     preferred_element_type=jnp.float32) + b_ref[...]
    s_ref[...] = 1.0 / (1.0 + jnp.exp(-logits))


# --------------------------------------------------------------------------
# Kernel 2: streaming reduce   sum(relu(x + 0.5)^2)  over lane-dense tiles
#   grid = (N_SPLIT parallel, steps arbitrary); output block (8, LANE) per
#   core is the resident accumulator (init at step 0, VALU adds per step).
# --------------------------------------------------------------------------
def _edge_loss_kernel(x_ref, out_ref):
    @pl.when(pl.program_id(1) == 0)
    def _():
        out_ref[...] = jnp.zeros_like(out_ref)

    t = jnp.maximum(x_ref[...] + 0.5, 0.0)
    sq = t * t
    # (tile_r, 128) -> (tile_r//8, 8, 128) is layout-preserving; the axis-0
    # reduce is pure vreg adds (no cross-sublane/lane movement per step).
    out_ref[...] += jnp.sum(sq.reshape(sq.shape[0] // 8, 8, LANE), axis=0)


def _edge_stream_loss(d):
    """Partial sums of relu(d + 0.5)^2 over one padded edge stream."""
    d = d.astype(jnp.float32)
    E = d.shape[0]
    rows = max(1, pl.cdiv(E, LANE))
    rows_per_core = pl.cdiv(rows, N_SPLIT)
    tile_r = min(TILE_R_MAX, _round_up(rows_per_core, 8))
    steps = pl.cdiv(rows_per_core, tile_r)
    rows_pad = N_SPLIT * steps * tile_r
    total = rows_pad * LANE

    # Neutral sentinel: relu(-1.0 + 0.5) = 0.  jnp.pad fuses into the
    # gather/subtract producer (single HBM write of the stream).
    d_pad = jnp.pad(d, (0, total - E), constant_values=-1.0)
    x2d = d_pad.reshape(rows_pad, LANE)

    out = pl.pallas_call(
        _edge_loss_kernel,
        out_shape=jax.ShapeDtypeStruct((N_SPLIT * 8, LANE), jnp.float32),
        grid_spec=pltpu.PrefetchScalarGridSpec(
            num_scalar_prefetch=0,
            grid=(N_SPLIT, steps),
            in_specs=[pl.BlockSpec((tile_r, LANE),
                                   lambda c, i: (c * steps + i, 0))],
            out_specs=pl.BlockSpec((8, LANE), lambda c, i: (c, 0)),
        ),
        compiler_params=pltpu.CompilerParams(
            dimension_semantics=("parallel", "arbitrary"),
            vmem_limit_bytes=VMEM_LIMIT_BYTES,
        ),
        cost_estimate=pl.CostEstimate(
            flops=4 * total, transcendentals=0,
            bytes_accessed=total * 4 + N_SPLIT * 8 * LANE * 4,
        ),
    )(x2d)
    return out


# --------------------------------------------------------------------------
# Wrapper
# --------------------------------------------------------------------------
@jax.jit
def sign_direction_loss(z, pos_edge_index, neg_edge_index, w1, b1, w2, b2):
    N, D = z.shape
    itemsize = jnp.dtype(z.dtype).itemsize

    # ---- per-node scores (tiled over nodes, pipelined by BlockSpec) ----
    W = jnp.concatenate([w1.reshape(D, 1), w2.reshape(D, 1)], axis=1).astype(z.dtype)
    b = jnp.concatenate([b1.reshape(1, 1), b2.reshape(1, 1)], axis=1).astype(jnp.float32)

    # Tile sized by bytes (~4 MiB block, <= 8 MiB double-buffered z), capped
    # at 8192 rows and at the (padded) node count; multiple of 8 sublanes.
    tile_n = max(8, min(8192,
                        SCORE_BLOCK_BYTES // (D * itemsize),
                        _round_up(N, 8)))
    tile_n = (tile_n // 8) * 8
    n_pad = _round_up(N, tile_n)
    z_p = z if n_pad == N else jnp.pad(z, ((0, n_pad - N), (0, 0)))

    score_cost = pl.CostEstimate(
        flops=4 * n_pad * D,
        transcendentals=2 * n_pad,
        bytes_accessed=n_pad * D * itemsize + D * 2 * itemsize + n_pad * 2 * 4,
    )

    scores = pl.pallas_call(
        _node_score_kernel,
        out_shape=jax.ShapeDtypeStruct((n_pad, 2), jnp.float32),
        grid_spec=pltpu.PrefetchScalarGridSpec(
            num_scalar_prefetch=0,
            grid=(n_pad // tile_n,),
            in_specs=[
                pl.BlockSpec((tile_n, D), lambda i: (i, 0)),
                pl.BlockSpec((D, 2), lambda i: (0, 0)),
                pl.BlockSpec((1, 2), lambda i: (0, 0)),
            ],
            out_specs=pl.BlockSpec((tile_n, 2), lambda i: (i, 0)),
        ),
        compiler_params=pltpu.CompilerParams(
            dimension_semantics=("parallel",),
            vmem_limit_bytes=VMEM_LIMIT_BYTES,
        ),
        cost_estimate=score_cost,
    )(z_p, W, b)

    s1 = scores[:, 0]
    s2 = scores[:, 1]

    # ---- tiny scalar gathers per edge (glue) ----
    # TODO(synk): per-edge scalar gather stays in JAX; it is O(E) bytes only.
    # Negation of the neg stream is folded into the operand order, so both
    # streams use the same loss element relu(x + 0.5)^2 and sentinel -1.0.
    d_pos = s1[pos_edge_index[0]] - s2[pos_edge_index[1]]
    d_neg = s2[neg_edge_index[1]] - s1[neg_edge_index[0]]

    pos_partial = _edge_stream_loss(d_pos)
    neg_partial = _edge_stream_loss(d_neg)
    return jnp.sum(pos_partial) + jnp.sum(neg_partial)


# --------------------------------------------------------------------------
# Pure-JAX reference mirroring the PyTorch module
# --------------------------------------------------------------------------
def _reference_loss(z, pos_edge_index, neg_edge_index, w1, b1, w2, b2):
    def sf1(x):
        return jax.nn.sigmoid(x @ w1 + b1)

    def sf2(x):
        return jax.nn.sigmoid(x @ w2 + b2)

    z11 = z[pos_edge_index[0], :]
    z12 = z[pos_edge_index[1], :]
    z21 = z[neg_edge_index[0], :]
    z22 = z[neg_edge_index[1], :]

    s1 = sf1(z11)
    s2 = sf2(z12)
    d = s1 - s2
    q = jnp.where(d > -0.5, jnp.full_like(d, -0.5), d)
    tmp = q - d
    pos_loss = jnp.sum(jnp.einsum("ij,ij->i", tmp, tmp))

    s1 = sf1(z21)
    s2 = sf2(z22)
    d = s1 - s2
    q = jnp.where(d > 0.5, d, jnp.full_like(d, 0.5))
    tmp = q - d
    neg_loss = jnp.sum(jnp.einsum("ij,ij->i", tmp, tmp))
    return pos_loss + neg_loss


if __name__ == "__main__":
    key = jax.random.PRNGKey(0)
    k_z, k_pos, k_neg, k_w1, k_b1, k_w2, k_b2 = jax.random.split(key, 7)

    num_nodes = 32
    emb_dim = 32
    num_pos_edges = 16
    num_neg_edges = 16

    z = jax.random.normal(k_z, (num_nodes, emb_dim), dtype=jnp.float32)
    pos_edge_index = jax.random.randint(
        k_pos, (2, num_pos_edges), 0, num_nodes, dtype=jnp.int32
    )
    neg_edge_index = jax.random.randint(
        k_neg, (2, num_neg_edges), 0, num_nodes, dtype=jnp.int32
    )

    lim = 1.0 / (emb_dim ** 0.5)
    w1 = jax.random.uniform(k_w1, (emb_dim, 1), minval=-lim, maxval=lim, dtype=jnp.float32)
    b1 = jax.random.uniform(k_b1, (1,), minval=-lim, maxval=lim, dtype=jnp.float32)
    w2 = jax.random.uniform(k_w2, (emb_dim, 1), minval=-lim, maxval=lim, dtype=jnp.float32)
    b2 = jax.random.uniform(k_b2, (1,), minval=-lim, maxval=lim, dtype=jnp.float32)

    loss = sign_direction_loss(z, pos_edge_index, neg_edge_index, w1, b1, w2, b2)
    jax.block_until_ready(loss)

    ref = _reference_loss(z, pos_edge_index, neg_edge_index, w1, b1, w2, b2)
    assert jnp.allclose(loss, ref, rtol=1e-5, atol=1e-5), (loss, ref)

    print("KERNEL_OK")
</pallas_src>

<mosaic_0001>
module attributes {stable_mosaic.version = 11 : i64} {
  func.func @_node_score_kernel(%arg0: i32, %arg1: memref<32x32xf32, #tpu.memory_space<vmem>>, %arg2: memref<32x2xf32, #tpu.memory_space<vmem>>, %arg3: memref<1x2xf32, #tpu.memory_space<vmem>>, %arg4: memref<32x2xf32, #tpu.memory_space<vmem>>) attributes {dimension_semantics = [#tpu.dimension_semantics<parallel>], iteration_bounds = array<i64: 1>, scalar_prefetch = 0 : i64, scratch_operands = 0 : i64, tpu.core_type = #tpu.core_type<tc>, window_params = [{transform_indices = @transform_0, window_bounds = array<i64: 32, 32>}, {pipeline_mode = #tpu.pipeline_mode<synchronous>, transform_indices = @transform_1, window_bounds = array<i64: 32, 2>}, {pipeline_mode = #tpu.pipeline_mode<synchronous>, transform_indices = @transform_2, window_bounds = array<i64: 1, 2>}, {transform_indices = @transform_3, window_bounds = array<i64: 32, 2>}]} {
    %c0 = arith.constant 0 : index
    %c0_0 = arith.constant 0 : index
    %0 = vector.load %arg1[%c0, %c0_0] : memref<32x32xf32, #tpu.memory_space<vmem>>, vector<32x32xf32>
    %c0_1 = arith.constant 0 : index
    %c0_2 = arith.constant 0 : index
    %1 = vector.load %arg2[%c0_1, %c0_2] : memref<32x2xf32, #tpu.memory_space<vmem>>, vector<32x2xf32>
    %cst = arith.constant dense<0.000000e+00> : vector<32x2xf32>
    %2 = tpu.matmul %0, %1, %cst {dimension_numbers = #tpu.dot_dimension_numbers<[1], [0], [0], [1], [0, 0, 1, 1], [], []>} : vector<32x32xf32>, vector<32x2xf32>, vector<32x2xf32> -> vector<32x2xf32>
    %c0_3 = arith.constant 0 : index
    %c0_4 = arith.constant 0 : index
    %3 = vector.load %arg3[%c0_3, %c0_4] : memref<1x2xf32, #tpu.memory_space<vmem>>, vector<1x2xf32>
    %4 = vector.broadcast %3 : vector<1x2xf32> to vector<32x2xf32>
    %5 = arith.addf %2, %4 : vector<32x2xf32>
    %cst_5 = arith.constant 0.000000e+00 : f32
    %6 = vector.broadcast %cst_5 : f32 to vector<32x2xf32>
    %7 = arith.subf %6, %5 : vector<32x2xf32>
    %8 = math.exp %7 : vector<32x2xf32>
    %cst_6 = arith.constant 1.000000e+00 : f32
    %9 = vector.broadcast %cst_6 : f32 to vector<32x2xf32>
    %10 = arith.addf %9, %8 : vector<32x2xf32>
    %cst_7 = arith.constant 1.000000e+00 : f32
    %11 = vector.broadcast %cst_7 : f32 to vector<32x2xf32>
    %12 = arith.divf %11, %10 : vector<32x2xf32>
    %c0_8 = arith.constant 0 : index
    %c0_9 = arith.constant 0 : index
    %13 = vector.load %arg4[%c0_8, %c0_9] : memref<32x2xf32, #tpu.memory_space<vmem>>, vector<32x2xf32>
    tpu.vector_store %arg4[%c0_8, %c0_9], %12 {strides = array<i32>} : memref<32x2xf32, #tpu.memory_space<vmem>>, vector<32x2xf32>,
    return
  }
  func.func @transform_0(%arg0: i32) -> (i32, i32) {
    %c0_i32 = arith.constant 0 : i32
    %c0_i32_0 = arith.constant 0 : i32
    return %arg0, %c0_i32 : i32, i32
  }
  func.func @transform_1(%arg0: i32) -> (i32, i32) {
    %c0_i32 = arith.constant 0 : i32
    %c0_i32_0 = arith.constant 0 : i32
    %c0_i32_1 = arith.constant 0 : i32
    return %c0_i32, %c0_i32_0 : i32, i32
  }
  func.func @transform_2(%arg0: i32) -> (i32, i32) {
    %c0_i32 = arith.constant 0 : i32
    %c0_i32_0 = arith.constant 0 : i32
    %c0_i32_1 = arith.constant 0 : i32
    return %c0_i32, %c0_i32_0 : i32, i32
  }
  func.func @transform_3(%arg0: i32) -> (i32, i32) {
    %c0_i32 = arith.constant 0 : i32
    %c0_i32_0 = arith.constant 0 : i32
    return %arg0, %c0_i32 : i32, i32
  }
}

module attributes {stable_mosaic.version = 11 : i64} {
  func.func @_edge_loss_kernel(%arg0: i32, %arg1: i32, %arg2: memref<8x128xf32, #tpu.memory_space<vmem>>, %arg3: memref<8x128xf32, #tpu.memory_space<vmem>>) attributes {dimension_semantics = [#tpu.dimension_semantics<parallel>, #tpu.dimension_semantics<arbitrary>], iteration_bounds = array<i64: 2, 1>, scalar_prefetch = 0 : i64, scratch_operands = 0 : i64, tpu.core_type = #tpu.core_type<tc>, window_params = [{transform_indices = @transform_0, window_bounds = array<i64: 8, 128>}, {transform_indices = @transform_1, window_bounds = array<i64: 8, 128>}]} {
    %c0_i32 = arith.constant 0 : i32
    %0 = arith.cmpi eq, %arg1, %c0_i32 : i32
    %1 = arith.extui %0 : i1 to i32
    %c0_i32_0 = arith.constant 0 : i32
    %2 = arith.cmpi ne, %1, %c0_i32_0 : i32
    scf.if %2 {
      %cst_8 = arith.constant 0.000000e+00 : f32
      %14 = vector.broadcast %cst_8 : f32 to vector<8x128xf32>
      %c0_9 = arith.constant 0 : index
      %c0_10 = arith.constant 0 : index
      %15 = vector.load %arg3[%c0_9, %c0_10] : memref<8x128xf32, #tpu.memory_space<vmem>>, vector<8x128xf32>
      tpu.vector_store %arg3[%c0_9, %c0_10], %14 {strides = array<i32>} : memref<8x128xf32, #tpu.memory_space<vmem>>, vector<8x128xf32>,
    } else {
    }
    %c0 = arith.constant 0 : index
    %c0_1 = arith.constant 0 : index
    %3 = vector.load %arg2[%c0, %c0_1] : memref<8x128xf32, #tpu.memory_space<vmem>>, vector<8x128xf32>
    %cst = arith.constant 5.000000e-01 : f32
    %4 = vector.broadcast %cst : f32 to vector<8x128xf32>
    %5 = arith.addf %3, %4 : vector<8x128xf32>
    %cst_2 = arith.constant 0.000000e+00 : f32
    %6 = vector.broadcast %cst_2 : f32 to vector<8x128xf32>
    %7 = arith.maximumf %5, %6 : vector<8x128xf32>
    %8 = arith.mulf %7, %7 : vector<8x128xf32>
    %c0_3 = arith.constant 0 : index
    %c0_4 = arith.constant 0 : index
    %9 = vector.load %arg3[%c0_3, %c0_4] : memref<8x128xf32, #tpu.memory_space<vmem>>, vector<8x128xf32>
    %10 = vector.shape_cast %8 : vector<8x128xf32> to vector<1x8x128xf32>
    %cst_5 = arith.constant dense<0.000000e+00> : vector<8x128xf32>
    %11 = vector.multi_reduction <add>, %10, %cst_5 [0] : vector<1x8x128xf32> to vector<8x128xf32>
    %12 = arith.addf %9, %11 : vector<8x128xf32>
    %c0_6 = arith.constant 0 : index
    %c0_7 = arith.constant 0 : index
    %13 = vector.load %arg3[%c0_6, %c0_7] : memref<8x128xf32, #tpu.memory_space<vmem>>, vector<8x128xf32>
    tpu.vector_store %arg3[%c0_6, %c0_7], %12 {strides = array<i32>} : memref<8x128xf32, #tpu.memory_space<vmem>>, vector<8x128xf32>,
    return
  }
  func.func @transform_0(%arg0: i32, %arg1: i32) -> (i32, i32) {
    %c1_i32 = arith.constant 1 : i32
    %0 = arith.muli %arg0, %c1_i32 : i32
    %1 = arith.addi %0, %arg1 : i32
    %c0_i32 = arith.constant 0 : i32
    %c0_i32_0 = arith.constant 0 : i32
    return %1, %c0_i32 : i32, i32
  }
  func.func @transform_1(%arg0: i32, %arg1: i32) -> (i32, i32) {
    %c0_i32 = arith.constant 0 : i32
    %c0_i32_0 = arith.constant 0 : i32
    return %arg0, %c0_i32 : i32, i32
  }
}

</mosaic_0001>

<bundles_post_ra>
// kernel: sub.2
= control target key start
LH: loop header
LB: loop body
LE: loop exit
PB: predicated region body
PF: predicated region fallthrough
CT: control target
= control target key end

     0   :  { %s34_s0 = inlined_call_operand.vmem [shape: f32[16], index: 0, kind: input, shape index: {}]   ;;  %s35_s1 = inlined_call_operand.vmem [shape: f32[16], index: 1, kind: input, shape index: {}]   ;;  %s36_s2 = inlined_call_operand.vmem [shape: f32[16], index: 2, kind: output, shape index: {}]  }
   0x1   :  { %v3_v0 = vld [vmem:[%s34_s0] sm:$0x1] }
   0x2   :  { %v4_v1 = vld [vmem:[%s35_s1] sm:$0x1] }
   0x3   :  { %v7_v2 = vsub.f32 %v3_v0, %v4_v1 }
   0x5   :  { %9 = vst [vmem:[%s36_s2] sm:$0x1] %v7_v2 }

</bundles_post_ra>
